<compile_context>
chip_gen: v7x
topology: tpu7x:2x2x1
jax: 0.10.0
libtpu: 0.0.40
codegen_flags: <defaults>
</compile_context>

<pallas_src>
import jax
import jax.numpy as jnp
from jax.experimental import pallas as pl
from jax.experimental.pallas import tpu as pltpu

IMAGE_RGB_MEAN = [0.485, 0.456, 0.406]
IMAGE_RGB_STD = [0.229, 0.224, 0.225]

# Per-array VMEM tile budget (bytes). in + out, double-buffered ~= 4x this,
# comfortably below every generation's scoped-VMEM default.
_TILE_BYTE_BUDGET = 2 * 1024 * 1024


def rgb_kernel(mean_ref, inv_std_ref, x_ref, o_ref):
    # mean_ref / inv_std_ref: (C, 1) f32 in VMEM, broadcast over the block.
    # x_ref / o_ref: (nb, C, hw_tile) lane-dense block.
    m = mean_ref[...][None, :, :]        # (1, C, 1)
    s = inv_std_ref[...][None, :, :]     # (1, C, 1)
    x = x_ref[...].astype(jnp.float32)
    o_ref[...] = ((x - m) * s).astype(o_ref.dtype)


def _largest_divisor_leq(n, cap):
    """Largest divisor of n that is <= cap (cap clamped to [1, n])."""
    cap = max(1, min(n, cap))
    for d in range(cap, 0, -1):
        if n % d == 0:
            return d
    return 1


def _choose_hw_tile(hw, bytes_per_lane_row, budget):
    """Pick a lane-dense tile size along the flattened H*W axis."""
    if hw * bytes_per_lane_row <= budget or hw % 128 != 0:
        # Whole spatial plane per step (always legal: equals the full dim).
        return hw
    # Largest multiple of 128 that divides hw and fits the byte budget.
    max_elems = max(128, budget // bytes_per_lane_row)
    n128 = hw // 128
    cap = max(1, min(n128, max_elems // 128))
    return 128 * _largest_divisor_leq(n128, cap)


def rgb_normalize(x, mean, std):
    N, C, H, W = x.shape
    HW = H * W
    x2 = x.reshape(N, C, HW)  # free for contiguous NCHW

    mean_v = jnp.asarray(mean, jnp.float32).reshape(C, 1)
    inv_std_v = (1.0 / jnp.asarray(std, jnp.float32)).reshape(C, 1)

    itemsize = x.dtype.itemsize
    hw_tile = _choose_hw_tile(HW, C * itemsize, _TILE_BYTE_BUDGET)
    n_hw = HW // hw_tile

    # If one image per step is still small, batch several images per grid step
    # (only when the spatial axis is untiled) to amortize per-step overhead.
    nb = 1
    if n_hw == 1:
        per_img_bytes = max(1, C * HW * itemsize)
        nb = _largest_divisor_leq(N, _TILE_BYTE_BUDGET // per_img_bytes)
    grid = (N // nb, n_hw)

    out = pl.pallas_call(
        rgb_kernel,
        out_shape=jax.ShapeDtypeStruct((N, C, HW), x.dtype),
        grid=grid,
        in_specs=[
            pl.BlockSpec((C, 1), lambda n, t: (0, 0)),          # mean
            pl.BlockSpec((C, 1), lambda n, t: (0, 0)),          # 1/std
            pl.BlockSpec((nb, C, hw_tile), lambda n, t: (n, 0, t)),
        ],
        out_specs=pl.BlockSpec((nb, C, hw_tile), lambda n, t: (n, 0, t)),
        compiler_params=pltpu.CompilerParams(
            dimension_semantics=("parallel", "parallel"),
        ),
    )(mean_v, inv_std_v, x2)
    return out.reshape(N, C, H, W)


if __name__ == "__main__":
    key = jax.random.PRNGKey(0)
    # RGB module implies 3 channels (buffers are shape (1, 3, 1, 1)).
    N, C, H, W = 2, 3, 16, 16
    x = jax.random.uniform(key, (N, C, H, W), dtype=jnp.float32)

    mean = jnp.array(IMAGE_RGB_MEAN, dtype=jnp.float32)  # buffer 'mean'
    std = jnp.array(IMAGE_RGB_STD, dtype=jnp.float32)    # buffer 'std'

    out = rgb_normalize(x, mean, std)
    out = jax.block_until_ready(out)

    # Reference check in plain JAX (broadcast over (1, C, 1, 1)), divide as in
    # the PyTorch module; reciprocal-multiply differs by ~1-2 ulp -> rtol=1e-5.
    ref = (x - mean.reshape(1, C, 1, 1)) / std.reshape(1, C, 1, 1)
    assert jnp.allclose(out, ref, atol=1e-6, rtol=1e-5), "mismatch vs reference"

    print("KERNEL_OK")
</pallas_src>

<mosaic_0001>
module attributes {stable_mosaic.version = 11 : i64} {
  func.func @rgb_kernel(%arg0: i32, %arg1: i32, %arg2: memref<3x1xf32, #tpu.memory_space<vmem>>, %arg3: memref<3x1xf32, #tpu.memory_space<vmem>>, %arg4: memref<2x3x256xf32, #tpu.memory_space<vmem>>, %arg5: memref<2x3x256xf32, #tpu.memory_space<vmem>>) attributes {dimension_semantics = [#tpu.dimension_semantics<parallel>, #tpu.dimension_semantics<parallel>], iteration_bounds = array<i64: 1, 1>, scalar_prefetch = 0 : i64, scratch_operands = 0 : i64, tpu.core_type = #tpu.core_type<tc>, window_params = [{pipeline_mode = #tpu.pipeline_mode<synchronous>, transform_indices = @transform_0, window_bounds = array<i64: 3, 1>}, {pipeline_mode = #tpu.pipeline_mode<synchronous>, transform_indices = @transform_1, window_bounds = array<i64: 3, 1>}, {transform_indices = @transform_2, window_bounds = array<i64: 2, 3, 256>}, {transform_indices = @transform_3, window_bounds = array<i64: 2, 3, 256>}]} {
    %c0 = arith.constant 0 : index
    %c0_0 = arith.constant 0 : index
    %0 = vector.load %arg2[%c0, %c0_0] : memref<3x1xf32, #tpu.memory_space<vmem>>, vector<3x1xf32>
    %1 = vector.shape_cast %0 : vector<3x1xf32> to vector<1x3x1xf32>
    %c0_1 = arith.constant 0 : index
    %c0_2 = arith.constant 0 : index
    %2 = vector.load %arg3[%c0_1, %c0_2] : memref<3x1xf32, #tpu.memory_space<vmem>>, vector<3x1xf32>
    %3 = vector.shape_cast %2 : vector<3x1xf32> to vector<1x3x1xf32>
    %c0_3 = arith.constant 0 : index
    %c0_4 = arith.constant 0 : index
    %c0_5 = arith.constant 0 : index
    %4 = vector.load %arg4[%c0_3, %c0_4, %c0_5] : memref<2x3x256xf32, #tpu.memory_space<vmem>>, vector<2x3x256xf32>
    %5 = vector.broadcast %1 : vector<1x3x1xf32> to vector<2x3x256xf32>
    %6 = arith.subf %4, %5 : vector<2x3x256xf32>
    %7 = vector.broadcast %3 : vector<1x3x1xf32> to vector<2x3x256xf32>
    %8 = arith.mulf %6, %7 : vector<2x3x256xf32>
    %c0_6 = arith.constant 0 : index
    %c0_7 = arith.constant 0 : index
    %c0_8 = arith.constant 0 : index
    %9 = vector.load %arg5[%c0_6, %c0_7, %c0_8] : memref<2x3x256xf32, #tpu.memory_space<vmem>>, vector<2x3x256xf32>
    tpu.vector_store %arg5[%c0_6, %c0_7, %c0_8], %8 {strides = array<i32>} : memref<2x3x256xf32, #tpu.memory_space<vmem>>, vector<2x3x256xf32>,
    return
  }
  func.func @transform_0(%arg0: i32, %arg1: i32) -> (i32, i32) {
    %c0_i32 = arith.constant 0 : i32
    %c0_i32_0 = arith.constant 0 : i32
    %c0_i32_1 = arith.constant 0 : i32
    return %c0_i32, %c0_i32_0 : i32, i32
  }
  func.func @transform_1(%arg0: i32, %arg1: i32) -> (i32, i32) {
    %c0_i32 = arith.constant 0 : i32
    %c0_i32_0 = arith.constant 0 : i32
    %c0_i32_1 = arith.constant 0 : i32
    return %c0_i32, %c0_i32_0 : i32, i32
  }
  func.func @transform_2(%arg0: i32, %arg1: i32) -> (i32, i32, i32) {
    %c0_i32 = arith.constant 0 : i32
    %c0_i32_0 = arith.constant 0 : i32
    return %arg0, %c0_i32, %arg1 : i32, i32, i32
  }
  func.func @transform_3(%arg0: i32, %arg1: i32) -> (i32, i32, i32) {
    %c0_i32 = arith.constant 0 : i32
    %c0_i32_0 = arith.constant 0 : i32
    return %arg0, %c0_i32, %arg1 : i32, i32, i32
  }
}

</mosaic_0001>

<bundles_post_ra>
// kernel: tpu_custom_call.1
= control target key start
LH: loop header
LB: loop body
LE: loop exit
PB: predicated region body
PF: predicated region fallthrough
CT: control target
= control target key end

     0   :  { %v55_v0 = vmov 0   ;;  %v56_v3 = vmov 839922192   ;;  %v25_v5 = vlaneseq  ;;  %s95_s0 = inlined_call_operand.vmem [shape: f32[3,1], index: 0, kind: input, shape index: {}]   ;;  %s96_s1 = inlined_call_operand.vmem [shape: f32[3,1], index: 1, kind: input, shape index: {}]   ;;  %s97_s2 = inlined_call_operand.vmem [shape: f32[2,3,256], index: 2, kind: input, shape index: {}]   ;;  %s98_s3 = inlined_call_operand.vmem [shape: f32[2,3,256], index: 3, kind: output, shape index: {}]  }
   0x1   :  { %54 = vset.pattern.permute.xlu0 %v55_v0  ;;  %v14_v1 = vld [vmem:[%s95_s0] sm:$0x7]  ;;  %v23_v4 = vunpack.c.l.s4 %v56_v3  ;;  %v17_v12 = vld [vmem:[%s97_s2 + $0x8] sm:$0x77] }
   0x2   :  { %20 = vperm.xlu0 %54, %v14_v1   ;;  %v15_v2 = vld [vmem:[%s96_s1] sm:$0x7]  ;;  %v26_v7 = vshrl.u32 %v25_v5, 7 }
   0x3   :  { %v24_v6 = vunpack.c.0.s8 %v23_v4  ;;  %v16_v11 = vld [vmem:[%s97_s2] sm:$0x77] }
   0x5   :  { %v27_v8 = vsub.s32 %v24_v6, %v26_v7 }
   0x6   :  { %34 = vperm.xlu0 %54, %v15_v2  }
  0x81   :  { %v21_v9 = vpop.permute.xlu0 %20 }
  0x82   :  { %v28_v10 = vrot.slane %v21_v9, %v27_v8 }
  0x84   :  { %v30_v14 = vsub.f32 %v16_v11, %v28_v10  ;;  %v31_v15 = vsub.f32 %v17_v12, %v28_v10 }
  0x85   :  { %v35_v13 = vpop.permute.xlu0 %34 }
  0x86   :  { %v42_v16 = vrot.slane %v35_v13, %v27_v8 }
  0x88   :  { %v44_v17 = vmul.f32 %v42_v16, %v30_v14  ;;  %v45_v18 = vmul.f32 %v42_v16, %v31_v15 }
  0x8a   :  { %46 = vst [vmem:[%s98_s3] sm:$0x77] %v44_v17  ;;  %47 = vst [vmem:[%s98_s3 + $0x8] sm:$0x77] %v45_v18 }

</bundles_post_ra>
